<compile_context>
chip_gen: v5e
topology: v5e:2x2
jax: 0.10.0
libtpu: 0.0.40
codegen_flags: <defaults>
</compile_context>

<pallas_src>
import functools
import math

import jax
import jax.numpy as jnp
from jax.experimental import pallas as pl
from jax.experimental.pallas import tpu as pltpu


def _mse_kernel(t_ref,        # (TB, S, 1)      timestamps
                mask_k_ref,   # (TB, P, 1, S)   mask laid out along the key axis
                mask_d_ref,   # (TB, P, S, 1)   mask laid out along the feature axis
                x_ref,        # (TB, P, S, D)
                alpha_ref,    # (1, 1)          nn.Linear(1, 1).weight
                div_ref,      # (1, H)          TPE inverse frequencies, H = tpe_dim // 2
                out_ref):     # (TB, P, S, D)
    f32 = jnp.float32
    TB, S, _ = t_ref.shape
    _, P, _, D = x_ref.shape
    H = div_ref.shape[-1]
    d_k = 2 * H
    inv_sqrt_dk = 1.0 / math.sqrt(d_k)

    # ---- alpha scale: (elu(alpha.weight * 1000) + 1), held as a (1, 1) tile ----
    aw = alpha_ref[...] * 1000.0
    scale = jnp.where(aw > 0.0, aw, jnp.exp(jnp.minimum(aw, 0.0)) - 1.0) + 1.0    # (1, 1)

    # ---- max-min normalise t and build the TPE phases ----
    t = t_ref[...]                                                                # (TB, S, 1)
    t_min = jnp.min(t, axis=1, keepdims=True)                                     # (TB, 1, 1)
    t_max = jnp.max(t, axis=1, keepdims=True)
    t_n = (t - t_min) * pl.reciprocal(t_max - t_min, approx=False)
    t_s = t_n * scale.reshape(1, 1, 1)                                            # (TB, S, 1)

    phases = t_s * div_ref[...].reshape(1, 1, H)                                  # (TB, S, H)
    feats = jnp.concatenate([jnp.sin(phases), jnp.cos(phases)], axis=-1)          # (TB, S, 2H)

    # scores = tpe @ tpe^T / sqrt(d_k) — one consolidated batched MXU matmul per step.
    scores = jnp.einsum("bsh,bth->bst", feats, feats,
                        preferred_element_type=f32) * inv_sqrt_dk                 # (TB, S, S)

    # ---- masking: drop key k for query q unless observed(k) or k == q ----
    row = jax.lax.broadcasted_iota(jnp.int32, (S, S), 0)
    col = jax.lax.broadcasted_iota(jnp.int32, (S, S), 1)
    eye = (row == col).astype(f32)                                                # (S, S)

    drop = (mask_k_ref[...] + eye[None, None]) < 0.5                              # (TB, P, S, S)
    scores_b = jnp.broadcast_to(scores[:, None], (TB, P, S, S))
    masked = jnp.where(drop, jnp.float32(-1e9), scores_b)
    masked = masked.reshape(TB * P, S, S)

    # ---- softmax over keys (divide lives on the EUP slot) ----
    m = jnp.max(masked, axis=-1, keepdims=True)
    e = jnp.exp(masked - m)
    p_attn = e * pl.reciprocal(jnp.sum(e, axis=-1, keepdims=True), approx=True)   # (TB*P, S, S)

    # ---- interpolate and blend with the observed values ----
    x = x_ref[...]                                                                # (TB, P, S, D)
    inter = jnp.einsum("bqk,bkd->bqd", p_attn, x.reshape(TB * P, S, D),
                       preferred_element_type=f32)
    inter = inter.reshape(TB, P, S, D)

    m_d = mask_d_ref[...]                                                         # (TB, P, S, 1)
    out_ref[...] = (x * m_d + inter * (1.0 - m_d)).astype(out_ref.dtype)


def _pick_batch_tile(B):
    """Largest batch tile (<= 8) dividing B while keeping >= 2 grid steps when possible
    (so v7x's two TensorCores both get work via the parallel grid axis)."""
    if B <= 1:
        return max(B, 1)
    for tb in (8, 4, 2, 1):
        if B % tb == 0 and B // tb >= 2:
            return tb
    return 1


@functools.partial(jax.jit, static_argnames=("tpe_dim",))
def market_state_estimation(t, x, mask, alpha_w, *, tpe_dim=16):
    B, P, S, D = x.shape
    H = tpe_dim // 2
    f32 = jnp.float32

    # Constant / layout prep done once in the wrapper (not per grid step).
    div_term = jnp.exp(
        jnp.arange(0, tpe_dim, 2, dtype=f32) * (-math.log(10000.0) / tpe_dim)
    ).reshape(1, H)
    t3 = t.astype(f32).reshape(B, S, 1)
    mask_k = mask.astype(f32).reshape(B, P, 1, S)   # for score masking (key axis in lanes)
    mask_d = mask.astype(f32).reshape(B, P, S, 1)   # for the final blend (feature axis in lanes)
    alpha = jnp.asarray(alpha_w, f32).reshape(1, 1)
    x32 = x.astype(f32)

    TB = _pick_batch_tile(B)
    grid = (B // TB,)

    return pl.pallas_call(
        _mse_kernel,
        out_shape=jax.ShapeDtypeStruct((B, P, S, D), f32),
        grid=grid,
        in_specs=[
            pl.BlockSpec((TB, S, 1), lambda b: (b, 0, 0)),
            pl.BlockSpec((TB, P, 1, S), lambda b: (b, 0, 0, 0)),
            pl.BlockSpec((TB, P, S, 1), lambda b: (b, 0, 0, 0)),
            pl.BlockSpec((TB, P, S, D), lambda b: (b, 0, 0, 0)),
            pl.BlockSpec((1, 1), lambda b: (0, 0)),
            pl.BlockSpec((1, H), lambda b: (0, 0)),
        ],
        out_specs=pl.BlockSpec((TB, P, S, D), lambda b: (b, 0, 0, 0)),
        compiler_params=pltpu.CompilerParams(dimension_semantics=("parallel",)),
    )(t3, mask_k, mask_d, x32, alpha, div_term)


# ------------------------ pure-JAX reference (mirrors the PyTorch code) ------------------------
def ref_forward(t, x, mask, alpha_w, tpe_dim=16):
    B, P, S, D = x.shape
    f32 = jnp.float32
    t = t.astype(f32)
    x = x.astype(f32)
    mask = mask.astype(f32)

    # max_min_norm_t
    t_min = jnp.min(t, axis=1, keepdims=True)
    t_max = jnp.max(t, axis=1, keepdims=True)
    t_n = (t - t_min) / (t_max - t_min)

    # (elu(alpha.weight * 1000) + 1) * t
    aw = jnp.asarray(alpha_w, f32).reshape(1, 1) * 1000.0
    scale = jnp.where(aw > 0.0, aw, jnp.expm1(aw)) + 1.0
    t_s = scale * t_n                                                     # (B, S)

    # TemporalPositionalEncoding (standard sinusoidal, interleaved sin/cos)
    div_term = jnp.exp(jnp.arange(0, tpe_dim, 2, dtype=f32) * (-math.log(10000.0) / tpe_dim))
    ang = t_s[..., None] * div_term                                       # (B, S, H)
    tpe = jnp.stack([jnp.sin(ang), jnp.cos(ang)], axis=-1).reshape(B, S, tpe_dim)

    # attention
    scores = jnp.einsum("bqh,bkh->bqk", tpe, tpe) / math.sqrt(tpe_dim)    # (B, S, S)
    scores = jnp.broadcast_to(scores[:, None], (B, P, S, S))
    eye = jnp.eye(S, dtype=f32)
    drop = (mask[:, :, None, :] + eye[None, None]) < 0.5
    scores = jnp.where(drop, -1e9, scores)
    p_attn = jax.nn.softmax(scores, axis=-1)
    inter = jnp.einsum("bpqk,bpkd->bpqd", p_attn, x)

    m = mask[..., None]
    return x * m + inter * (1.0 - m)


if __name__ == "__main__":
    B, P, S, D = 2, 4, 16, 16        # batch, users, sequence_length, feature dim
    TPE_DIM = 16

    key = jax.random.PRNGKey(0)
    kt, kx, km, ka = jax.random.split(key, 4)
    t = jax.random.uniform(kt, (B, S), jnp.float32)
    x = jax.random.normal(kx, (B, P, S, D), jnp.float32)
    mask = (jax.random.uniform(km, (B, P, S)) > 0.35).astype(jnp.float32)
    alpha_w = 0.003 * jax.random.normal(ka, (1, 1), jnp.float32)          # nn.Linear(1,1).weight

    out = jax.block_until_ready(
        market_state_estimation(t, x, mask, alpha_w, tpe_dim=TPE_DIM))
    ref = jax.block_until_ready(ref_forward(t, x, mask, alpha_w, tpe_dim=TPE_DIM))

    assert out.shape == (B, P, S, D)
    if not jnp.allclose(out, ref, atol=5e-3, rtol=5e-3):
        max_err = float(jnp.max(jnp.abs(out - ref)))
        raise AssertionError(f"Pallas kernel mismatch vs reference, max abs err = {max_err}")
    print("KERNEL_OK")
</pallas_src>

<mosaic_0001>
module attributes {stable_mosaic.version = 11 : i64} {
  func.func @_mse_kernel(%arg0: i32, %arg1: memref<1x16x1xf32, #tpu.memory_space<vmem>>, %arg2: memref<1x4x1x16xf32, #tpu.memory_space<vmem>>, %arg3: memref<1x4x16x1xf32, #tpu.memory_space<vmem>>, %arg4: memref<1x4x16x16xf32, #tpu.memory_space<vmem>>, %arg5: memref<1x1xf32, #tpu.memory_space<vmem>>, %arg6: memref<1x8xf32, #tpu.memory_space<vmem>>, %arg7: memref<1x4x16x16xf32, #tpu.memory_space<vmem>>) attributes {dimension_semantics = [#tpu.dimension_semantics<parallel>], iteration_bounds = array<i64: 2>, scalar_prefetch = 0 : i64, scratch_operands = 0 : i64, tpu.core_type = #tpu.core_type<tc>, window_params = [{transform_indices = @transform_0, window_bounds = array<i64: 1, 16, 1>}, {transform_indices = @transform_1, window_bounds = array<i64: 1, 4, 1, 16>}, {transform_indices = @transform_2, window_bounds = array<i64: 1, 4, 16, 1>}, {transform_indices = @transform_3, window_bounds = array<i64: 1, 4, 16, 16>}, {pipeline_mode = #tpu.pipeline_mode<synchronous>, transform_indices = @transform_4, window_bounds = array<i64: 1, 1>}, {pipeline_mode = #tpu.pipeline_mode<synchronous>, transform_indices = @transform_5, window_bounds = array<i64: 1, 8>}, {transform_indices = @transform_6, window_bounds = array<i64: 1, 4, 16, 16>}]} {
    %c0 = arith.constant 0 : index
    %c0_0 = arith.constant 0 : index
    %0 = vector.load %arg5[%c0, %c0_0] : memref<1x1xf32, #tpu.memory_space<vmem>>, vector<1x1xf32>
    %cst = arith.constant 1.000000e+03 : f32
    %1 = vector.broadcast %cst : f32 to vector<1x1xf32>
    %2 = arith.mulf %0, %1 : vector<1x1xf32>
    %cst_1 = arith.constant 0.000000e+00 : f32
    %3 = vector.broadcast %cst_1 : f32 to vector<1x1xf32>
    %4 = arith.cmpf ogt, %2, %3 : vector<1x1xf32>
    %cst_2 = arith.constant 0.000000e+00 : f32
    %5 = vector.broadcast %cst_2 : f32 to vector<1x1xf32>
    %6 = arith.minimumf %2, %5 : vector<1x1xf32>
    %7 = math.exp %6 : vector<1x1xf32>
    %cst_3 = arith.constant 1.000000e+00 : f32
    %8 = vector.broadcast %cst_3 : f32 to vector<1x1xf32>
    %9 = arith.subf %7, %8 : vector<1x1xf32>
    %10 = arith.select %4, %2, %9 : vector<1x1xi1>, vector<1x1xf32>
    %cst_4 = arith.constant 1.000000e+00 : f32
    %11 = vector.broadcast %cst_4 : f32 to vector<1x1xf32>
    %12 = arith.addf %10, %11 : vector<1x1xf32>
    %c0_5 = arith.constant 0 : index
    %c0_6 = arith.constant 0 : index
    %c0_7 = arith.constant 0 : index
    %13 = vector.load %arg1[%c0_5, %c0_6, %c0_7] : memref<1x16x1xf32, #tpu.memory_space<vmem>>, vector<1x16x1xf32>
    %cst_8 = arith.constant dense<0x7F800000> : vector<1x1xf32>
    %14 = vector.multi_reduction <minimumf>, %13, %cst_8 [1] : vector<1x16x1xf32> to vector<1x1xf32>
    %15 = vector.shape_cast %14 : vector<1x1xf32> to vector<1x1x1xf32>
    %cst_9 = arith.constant dense<0xFF800000> : vector<1x1xf32>
    %16 = vector.multi_reduction <maximumf>, %13, %cst_9 [1] : vector<1x16x1xf32> to vector<1x1xf32>
    %17 = vector.shape_cast %16 : vector<1x1xf32> to vector<1x1x1xf32>
    %18 = vector.broadcast %15 : vector<1x1x1xf32> to vector<1x16x1xf32>
    %19 = arith.subf %13, %18 : vector<1x16x1xf32>
    %20 = arith.subf %17, %15 : vector<1x1x1xf32>
    %21 = tpu.reciprocal %20 : vector<1x1x1xf32> -> vector<1x1x1xf32>
    %22 = vector.broadcast %21 : vector<1x1x1xf32> to vector<1x16x1xf32>
    %23 = arith.mulf %19, %22 : vector<1x16x1xf32>
    %24 = vector.shape_cast %12 : vector<1x1xf32> to vector<1x1x1xf32>
    %25 = vector.broadcast %24 : vector<1x1x1xf32> to vector<1x16x1xf32>
    %26 = arith.mulf %23, %25 : vector<1x16x1xf32>
    %c0_10 = arith.constant 0 : index
    %c0_11 = arith.constant 0 : index
    %27 = vector.load %arg6[%c0_10, %c0_11] : memref<1x8xf32, #tpu.memory_space<vmem>>, vector<1x8xf32>
    %28 = vector.shape_cast %27 : vector<1x8xf32> to vector<1x1x8xf32>
    %29 = vector.broadcast %26 : vector<1x16x1xf32> to vector<1x16x8xf32>
    %30 = vector.broadcast %28 : vector<1x1x8xf32> to vector<1x16x8xf32>
    %31 = arith.mulf %29, %30 : vector<1x16x8xf32>
    %32 = math.sin %31 : vector<1x16x8xf32>
    %33 = math.cos %31 : vector<1x16x8xf32>
    %34 = tpu.concatenate %32, %33 in 2 : vector<1x16x8xf32>, vector<1x16x8xf32> -> vector<1x16x16xf32>
    "tpu.trace_start"() <{level = 10 : i32, message = "bsh,bth->bst"}> : () -> ()
    %cst_12 = arith.constant dense<0.000000e+00> : vector<1x16x16xf32>
    %35 = tpu.matmul %34, %34, %cst_12 {dimension_numbers = #tpu.dot_dimension_numbers<[2], [2], [1], [1], [0, 0, 0, 1, 1, 1], [0], [0]>} : vector<1x16x16xf32>, vector<1x16x16xf32>, vector<1x16x16xf32> -> vector<1x16x16xf32>
    "tpu.trace_stop"() : () -> ()
    %cst_13 = arith.constant 2.500000e-01 : f32
    %36 = vector.broadcast %cst_13 : f32 to vector<1x16x16xf32>
    %37 = arith.mulf %35, %36 : vector<1x16x16xf32>
    %38 = tpu.iota {dimensions = array<i32: 0>} : vector<16x16xi32>
    %39 = tpu.iota {dimensions = array<i32: 1>} : vector<16x16xi32>
    %40 = arith.cmpi eq, %38, %39 : vector<16x16xi32>
    %41 = arith.extui %40 : vector<16x16xi1> to vector<16x16xi32>
    %42 = arith.sitofp %41 : vector<16x16xi32> to vector<16x16xf32>
    %c0_14 = arith.constant 0 : index
    %c0_15 = arith.constant 0 : index
    %c0_16 = arith.constant 0 : index
    %c0_17 = arith.constant 0 : index
    %43 = vector.load %arg2[%c0_14, %c0_15, %c0_16, %c0_17] : memref<1x4x1x16xf32, #tpu.memory_space<vmem>>, vector<1x4x1x16xf32>
    %44 = vector.shape_cast %42 : vector<16x16xf32> to vector<1x1x16x16xf32>
    %45 = vector.broadcast %43 : vector<1x4x1x16xf32> to vector<1x4x16x16xf32>
    %46 = vector.broadcast %44 : vector<1x1x16x16xf32> to vector<1x4x16x16xf32>
    %47 = arith.addf %45, %46 : vector<1x4x16x16xf32>
    %cst_18 = arith.constant 5.000000e-01 : f32
    %48 = vector.broadcast %cst_18 : f32 to vector<1x4x16x16xf32>
    %49 = arith.cmpf olt, %47, %48 : vector<1x4x16x16xf32>
    %50 = vector.shape_cast %37 : vector<1x16x16xf32> to vector<1x1x16x16xf32>
    %51 = vector.shape_cast %50 : vector<1x1x16x16xf32> to vector<1x1x16x16xf32>
    %52 = vector.broadcast %51 : vector<1x1x16x16xf32> to vector<1x4x16x16xf32>
    %cst_19 = arith.constant -1.000000e+09 : f32
    %53 = vector.broadcast %cst_19 : f32 to vector<1x4x16x16xf32>
    %54 = arith.select %49, %53, %52 : vector<1x4x16x16xi1>, vector<1x4x16x16xf32>
    %55 = vector.shape_cast %54 : vector<1x4x16x16xf32> to vector<4x16x16xf32>
    %cst_20 = arith.constant dense<0xFF800000> : vector<4x16xf32>
    %56 = vector.multi_reduction <maximumf>, %55, %cst_20 [2] : vector<4x16x16xf32> to vector<4x16xf32>
    %57 = vector.shape_cast %56 : vector<4x16xf32> to vector<4x16x1xf32>
    %58 = vector.broadcast %57 : vector<4x16x1xf32> to vector<4x16x16xf32>
    %59 = arith.subf %55, %58 : vector<4x16x16xf32>
    %60 = math.exp %59 : vector<4x16x16xf32>
    %cst_21 = arith.constant dense<0.000000e+00> : vector<4x16xf32>
    %61 = vector.multi_reduction <add>, %60, %cst_21 [2] : vector<4x16x16xf32> to vector<4x16xf32>
    %62 = vector.shape_cast %61 : vector<4x16xf32> to vector<4x16x1xf32>
    %63 = tpu.reciprocal %62 {approx = true} : vector<4x16x1xf32> -> vector<4x16x1xf32>
    %64 = vector.broadcast %63 : vector<4x16x1xf32> to vector<4x16x16xf32>
    %65 = arith.mulf %60, %64 : vector<4x16x16xf32>
    %c0_22 = arith.constant 0 : index
    %c0_23 = arith.constant 0 : index
    %c0_24 = arith.constant 0 : index
    %c0_25 = arith.constant 0 : index
    %66 = vector.load %arg4[%c0_22, %c0_23, %c0_24, %c0_25] : memref<1x4x16x16xf32, #tpu.memory_space<vmem>>, vector<1x4x16x16xf32>
    %67 = vector.shape_cast %66 : vector<1x4x16x16xf32> to vector<4x16x16xf32>
    "tpu.trace_start"() <{level = 10 : i32, message = "bqk,bkd->bqd"}> : () -> ()
    %cst_26 = arith.constant dense<0.000000e+00> : vector<4x16x16xf32>
    %68 = tpu.matmul %65, %67, %cst_26 {dimension_numbers = #tpu.dot_dimension_numbers<[2], [1], [1], [2], [0, 0, 0, 1, 1, 2], [0], [0]>} : vector<4x16x16xf32>, vector<4x16x16xf32>, vector<4x16x16xf32> -> vector<4x16x16xf32>
    "tpu.trace_stop"() : () -> ()
    %69 = vector.shape_cast %68 : vector<4x16x16xf32> to vector<1x4x16x16xf32>
    %c0_27 = arith.constant 0 : index
    %c0_28 = arith.constant 0 : index
    %c0_29 = arith.constant 0 : index
    %c0_30 = arith.constant 0 : index
    %70 = vector.load %arg3[%c0_27, %c0_28, %c0_29, %c0_30] : memref<1x4x16x1xf32, #tpu.memory_space<vmem>>, vector<1x4x16x1xf32>
    %71 = vector.broadcast %70 : vector<1x4x16x1xf32> to vector<1x4x16x16xf32>
    %72 = arith.mulf %66, %71 : vector<1x4x16x16xf32>
    %cst_31 = arith.constant 1.000000e+00 : f32
    %73 = vector.broadcast %cst_31 : f32 to vector<1x4x16x1xf32>
    %74 = arith.subf %73, %70 : vector<1x4x16x1xf32>
    %75 = vector.broadcast %74 : vector<1x4x16x1xf32> to vector<1x4x16x16xf32>
    %76 = arith.mulf %69, %75 : vector<1x4x16x16xf32>
    %77 = arith.addf %72, %76 : vector<1x4x16x16xf32>
    %c0_32 = arith.constant 0 : index
    %c0_33 = arith.constant 0 : index
    %c0_34 = arith.constant 0 : index
    %c0_35 = arith.constant 0 : index
    %78 = vector.load %arg7[%c0_32, %c0_33, %c0_34, %c0_35] : memref<1x4x16x16xf32, #tpu.memory_space<vmem>>, vector<1x4x16x16xf32>
    tpu.vector_store %arg7[%c0_32, %c0_33, %c0_34, %c0_35], %77 {strides = array<i32>} : memref<1x4x16x16xf32, #tpu.memory_space<vmem>>, vector<1x4x16x16xf32>,
    return
  }
  func.func @transform_0(%arg0: i32) -> (i32, i32, i32) {
    %c0_i32 = arith.constant 0 : i32
    %c0_i32_0 = arith.constant 0 : i32
    %c0_i32_1 = arith.constant 0 : i32
    return %arg0, %c0_i32, %c0_i32_0 : i32, i32, i32
  }
  func.func @transform_1(%arg0: i32) -> (i32, i32, i32, i32) {
    %c0_i32 = arith.constant 0 : i32
    %c0_i32_0 = arith.constant 0 : i32
    %c0_i32_1 = arith.constant 0 : i32
    %c0_i32_2 = arith.constant 0 : i32
    return %arg0, %c0_i32, %c0_i32_0, %c0_i32_1 : i32, i32, i32, i32
  }
  func.func @transform_2(%arg0: i32) -> (i32, i32, i32, i32) {
    %c0_i32 = arith.constant 0 : i32
    %c0_i32_0 = arith.constant 0 : i32
    %c0_i32_1 = arith.constant 0 : i32
    %c0_i32_2 = arith.constant 0 : i32
    return %arg0, %c0_i32, %c0_i32_0, %c0_i32_1 : i32, i32, i32, i32
  }
  func.func @transform_3(%arg0: i32) -> (i32, i32, i32, i32) {
    %c0_i32 = arith.constant 0 : i32
    %c0_i32_0 = arith.constant 0 : i32
    %c0_i32_1 = arith.constant 0 : i32
    %c0_i32_2 = arith.constant 0 : i32
    return %arg0, %c0_i32, %c0_i32_0, %c0_i32_1 : i32, i32, i32, i32
  }
  func.func @transform_4(%arg0: i32) -> (i32, i32) {
    %c0_i32 = arith.constant 0 : i32
    %c0_i32_0 = arith.constant 0 : i32
    %c0_i32_1 = arith.constant 0 : i32
    return %c0_i32, %c0_i32_0 : i32, i32
  }
  func.func @transform_5(%arg0: i32) -> (i32, i32) {
    %c0_i32 = arith.constant 0 : i32
    %c0_i32_0 = arith.constant 0 : i32
    %c0_i32_1 = arith.constant 0 : i32
    return %c0_i32, %c0_i32_0 : i32, i32
  }
  func.func @transform_6(%arg0: i32) -> (i32, i32, i32, i32) {
    %c0_i32 = arith.constant 0 : i32
    %c0_i32_0 = arith.constant 0 : i32
    %c0_i32_1 = arith.constant 0 : i32
    %c0_i32_2 = arith.constant 0 : i32
    return %arg0, %c0_i32, %c0_i32_0, %c0_i32_1 : i32, i32, i32, i32
  }
}

</mosaic_0001>

<bundles_post_ra>
// kernel: market_state_estimation.1
= control target key start
LH: loop header
LB: loop body
LE: loop exit
PB: predicated region body
PF: predicated region fallthrough
CT: control target
= control target key end

     0   :  { %s2210_s0 = inlined_call_operand.vmem [shape: f32[2,16,1], index: 0, kind: input, shape index: {}]   ;;  %s2211_s1 = inlined_call_operand.vmem [shape: f32[2,4,1,16], index: 1, kind: input, shape index: {}]   ;;  %s2212_s2 = inlined_call_operand.vmem [shape: f32[2,4,16,1], index: 2, kind: input, shape index: {}]   ;;  %s2213_s3 = inlined_call_operand.vmem [shape: f32[2,4,16,16], index: 3, kind: input, shape index: {}]   ;;  %s2214_s4 = inlined_call_operand.<no memory space> [shape: f32[1,1], index: 4, kind: input, shape index: {}]   ;;  %s2215_s5 = inlined_call_operand.vmem [shape: f32[1,8], index: 5, kind: input, shape index: {}]   ;;  %s2216_s6 = inlined_call_operand.hbm [shape: f32[2,4,16,16], index: 6, kind: output, shape index: {}]  }
   0x1   :  { %v11_v0 = vstv %s2214_s4 }
   0x2   :  { %12 = vst [vmem:[#allocation2] sm:$0x1] %v11_v0 }
   0x3   :  { %13 = vsyncpa [#allocation4], 0 }
   0x4   :  { %15 = vsyncpa [#allocation4 + $0x1], 0  ;;  %s1800_s23 = smov 0   ;;  %s1802_s24 = smov 0  }
   0x5   :  { %s1804_s25 = smov 0   ;;  %s1806_s26 = smov 0  }
   0x6 LB: > { %s1821_s4 = sadd.s32 4294967295, %s1750_s26   ;;  %s1545_s27 = sadd.s32 4294967294, %s1750_s26   ;;  %s1750_s26 = sphi %s1806_s26, %s2226_s26   ;;  %s1746_s25 = sphi %s1804_s25, %s2225_s25   ;;  %s1742_s24 = sphi %s1802_s24, %s2224_s24   ;;  %s1738_s23 = sphi %s1800_s23, %s2223_s23  }
   0x7   : > { %s1825_s28 = sadd.s32 1, %s1750_s26   ;;  %s174_s29 = sadd.s32 1, %s1746_s25 }
   0x8   : > { %s171_s30 = ssub.s32 %s1750_s26, %s1825_s28  ;;  %p184_p0 = scmp.ne.s32.totalorder %s1746_s25, %s1742_s24 }
   0x9   : > { %p172_p1 = scmp.eq.s32.totalorder %s171_s30, 0  ;;  %p185_p2 = scmp.eq.s32.totalorder %s1821_s4, 1 }
   0xa   : > { %p190_p3 = scmp.ne.s32.totalorder %s1742_s24, %s1738_s23  ;;  %p191_p4 = scmp.eq.s32.totalorder %s1545_s27, 1 }
   0xb   : > { %s1836_s7 = scalar_select %p172_p1, %s1746_s25, %s174_s29  }
   0xc   : > { %p1838_p5 = por %p185_p2, %p184_p0  ;;  %p1842_p6 = por %p191_p4, %p190_p3 }
   0xd   : > { %p1548_p7 = scmp.ge.s32.totalorder %s1750_s26, 1  ;;  %p246_p8 = scmp.lt.s32.totalorder %s1750_s26, 3 }
   0xf   : > { %p247_p9 = pnand %p1548_p7, %p246_p8 }
  0x10   : > { %p290_p10 = scmp.lt.s32.totalorder (!%p247_p9), %s1821_s4, 1  ;;  %s1759_s17 = smov (!%p247_p9), 8  }
  0x11   : > { %250 = sbr.rel (%p247_p9) target bundleno = 976 (0x3d0), region = 44  ;;  %s287_s13 = sand.u32 (!%p247_p9), 1, %s1742_s24  }
  0x12   : > { %s1592_s16 = sshll.u32 (!%p247_p9), %s1821_s4, 6 }
  0x13   : > { %s1443_s20 = scalar_lea.hbm (!%p247_p9), %s2216_s6, %s1592_s16 }
  0x16   : > { %v1752_v1 = vmov 0   ;;  %s1852_s10 = scalar_select %p290_p10, %s1821_s4, 1  ;;  %vm320_vm0 = vcmask 7168   ;;  %v309_v2 = vld [vmem:[#allocation2] sm:$0x1] }
  0x17   : > { %1644 = vset.pattern.permute.xlu0 %v1752_v1  ;;  %1645 = vset.pattern.permute.xlu1 %v1752_v1  ;;  %v310_v8 = vmul.f32 1000.0, %v309_v2  ;;  %v1647_v48 = vld [vmem:[%s2215_s5] ss:$0 sm:$0xff] }
  0x18   : > { %1646 = vset.pattern.permute.xlu2 %v1752_v1  ;;  %s1589_s11 = sshll.u32 %s1852_s10, 4  ;;  %s1552_s18 = sshll.u32 %s1852_s10, 2 }
  0x19   : > { %s294_s14 = scalar_lea.vmem %s2210_s0, %s1589_s11  ;;  %v312_v14 = vmin.f32 %v310_v8, 0.0  ;;  %vm311_vm1 = vcmp.gt.f32.partialorder %v310_v8, 0.0  ;;  %s298_s21 = scalar_lea.vmem %s2211_s1, %s1552_s18 }
  0x1a   : > { %v318_v3 = vld [vmem:[%s294_s14] sm:$0xff]  ;;  %v319_v4 = vld [vmem:[%s294_s14 + $0x8] sm:$0xff]  ;;  %s1590_s22 = sshll.u32 %s1852_s10, 6  ;;  %s1549_s14 = sshll.u32 %s287_s13, 6 }
  0x1b   : > { %v321_v5 = vsel %vm320_vm0, %v318_v3, inf  ;;  %v322_v6 = vsel %vm320_vm0, %v319_v4, inf  ;;  %v330_v7 = vsel %vm320_vm0, %v318_v3, -inf  ;;  %v331_v10 = vsel %vm320_vm0, %v319_v4, -inf  ;;  %s303_s30 = scalar_lea.vmem %s2212_s2, %s1590_s22  ;;  %s2094_s12 = scalar_lea.vmem %s2213_s3, %s1590_s22 }
  0x1c   : > { %v323_v9 = vmin.f32 %v321_v5, %v322_v6  ;;  %v332_v11 = vmax.f32 %v330_v7, %v331_v10  ;;  %v313_v19 = vmul.f32 1.442695, %v312_v14  ;;  %v1754_v10 = vmov 1326507024   ;;  %s2150_s15 = scalar_lea.vmem [#allocation3], %s1549_s14  ;;  %s1432_s22 = scalar_lea.sflag [#allocation4], %s287_s13 }
  0x1d   : > { %v1756_v14 = vmov 2102212464   ;;  %s1444_s4 = sshll.u32 %s2150_s15, 4  ;;  %s1708_s11 = scalar_lea.hbm %s2216_s6, 128  ;;  %s1445_s4 = int_to_ptr.vmem [resolvable:$true] %s1444_s4 }
  0x1e   : > { %v324_v12 = vrot.slane %v323_v9, 4  ;;  %v333_v13 = vrot.slane %v332_v11, 4  ;;  %1652 = vpow2.f32 %v313_v19 }
  0x20   : > { %v325_v15 = vmin.f32 %v323_v9, %v324_v12  ;;  %v334_v16 = vmax.f32 %v332_v11, %v333_v13  ;;  %v1755_v12 = vmov 2475754826  }
  0x22   : > { %v326_v17 = vrot.slane %v325_v15, 2  ;;  %v335_v18 = vrot.slane %v334_v16, 2 }
  0x24   : > { %v327_v20 = vmin.f32 %v325_v15, %v326_v17  ;;  %v336_v21 = vmax.f32 %v334_v16, %v335_v18  ;;  %v1653_v27 = vpop.eup %1652  ;;  %v1757_v18 = vmov 2131351028  }
  0x25   : > { %v1557_v28 = vadd.f32 -1.0, %v1653_v27 }
  0x26   : > { %v328_v22 = vrot.slane %v327_v20, 1  ;;  %v337_v23 = vrot.slane %v336_v21, 1 }
  0x27   : > { %v316_v31 = vsel %vm311_vm1, %v310_v8, %v1557_v28  ;;  %v1753_v8 = vmov 920167782  }
  0x28   : > { %v329_v24 = vmin.f32 %v327_v20, %v328_v22  ;;  %v338_v25 = vmax.f32 %v336_v21, %v337_v23  ;;  %v317_v35 = vadd.f32 1.0, %v316_v31  ;;  %v1758_v21 = vmov 683565275  }
  0x2a   : > { %v341_v26 = vsub.f32 %v338_v25, %v329_v24  ;;  %v340_v38 = vsub.f32 %v319_v4, %v329_v24  ;;  %v359_v41 = vperm.slane %v317_v35, 0  ;;  %v339_v44 = vsub.f32 %v318_v3, %v329_v24 }
  0x2c   : > { %1654 = vrcp.f32 %v341_v26  ;;  %v353_v32 = vand.u32 2147483648, %v341_v26  ;;  %vm347_vm2 = vweird.f32 %v341_v26  ;;  %v351_v34 = vand.u32 2147483647, %v341_v26 }
  0x2e   : > { %v354_v37 = vor.u32 1.1754944e-38, %v353_v32  ;;  %vm352_vm5 = vcmp.eq.f32.partialorder %v351_v34, 8.507059e+37 }
  0x32   : > { %v1655_v29 = vpop.eup %1654 }
  0x33   : > { %v343_v30 = vmul.f32 %v1655_v29, %v341_v26  ;;  %vm348_vm3 = vweird.f32 %v1655_v29 }
  0x34   : > { %vm349_vm4 = vmor %vm347_vm2, %vm348_vm3 }
  0x35   : > { %v344_v33 = vsub.f32 1.0, %v343_v30 }
  0x37   : > { %v345_v36 = vmul.f32 %v1655_v29, %v344_v33 }
  0x39   : > { %v346_v39 = vadd.f32 %v1655_v29, %v345_v36 }
  0x3b   : > { %v350_v40 = vsel %vm349_vm4, %v1655_v29, %v346_v39 }
  0x3c   : > { %v355_v42 = vsel %vm352_vm5, %v354_v37, %v350_v40 }
  0x3d   : > { %v357_v43 = vmul.f32 %v355_v42, %v340_v38  ;;  %v356_v46 = vmul.f32 %v355_v42, %v339_v44 }
  0x3f   : > { %v362_v45 = vmul.f32 %v359_v41, %v357_v43  ;;  %v361_v47 = vmul.f32 %v359_v41, %v356_v46 }
  0x41   : > { %371 = vperm.xlu0 %1644, %v362_v45  }
  0x49   : > { %366 = vperm.xlu0 %1644, %v361_v47  }
  0xb3   : > { %v372_v49 = vpop.permute.xlu0 %371 }
  0xb4   : > { %v1862_v50 = vmul.f32 %v1647_v48, %v372_v49 }
  0xb6   : > { %v537_v51 = vand.u32 2139095040, %v1862_v50  ;;  %v534_v52 = vand.u32 2147483647, %v1862_v50 }
  0xb8   : > { %v538_v53 = vshrl.u32 %v537_v51, 23  ;;  %v541_v56 = vand.u32 8388607, %v534_v52 }
  0xba   : > { %v1561_v54 = vadd.s32 4294967169, %v538_v53  ;;  %v542_v62 = vor.u32 8388608, %v541_v56 }
  0xbb   : > { %v367_v55 = vpop.permute.xlu0 %366 }
  0xbc   : > { %v544_v57 = vadd.s32 1, %v1561_v54  ;;  %v1868_v58 = vmul.f32 %v1647_v48, %v367_v55  ;;  %v1874_v6 = vshll.u32 %v542_v62, 8 }
  0xbe   : > { %vm545_vm6 = vcmp.gt.s32.totalorder %v544_v57, 0  ;;  %v379_v59 = vand.u32 2147483647, %v1868_v58  ;;  %v382_v60 = vand.u32 2139095040, %v1868_v58  ;;  %v583_v32 = vand.u32 65535, %v1874_v6 }
  0xbf   : > { %v546_v61 = vsel %vm545_vm6, %v544_v57, 0  ;;  %v584_v33 = vshrl.u32 %v1874_v6, 16 }
  0xc0   : > { %v548_v63 = vand.u32 31, %v546_v61  ;;  %v383_v0 = vshrl.u32 %v382_v60, 23  ;;  %v386_v2 = vand.u32 8388607, %v379_v59  ;;  %v1876_v7 = vshrl.u32 %v546_v61, 5 }
  0xc2   : > { %v549_v3 = vsub.s32 32, %v548_v63  ;;  %v1558_v4 = vadd.s32 4294967169, %v383_v0  ;;  %v387_v5 = vor.u32 8388608, %v386_v2  ;;  %v560_v15 = vshll.u32 %v1756_v14, %v548_v63 }
  0xc3   : > { %v563_v16 = vshll.u32 %v1753_v8, %v548_v63  ;;  %v551_v22 = vshll.u32 %v1758_v21, %v548_v63  ;;  %v554_v23 = vshll.u32 %v1755_v12, %v548_v63  ;;  %v557_v26 = vshll.u32 %v1757_v18, %v548_v63 }
  0xc4   : > { %v561_v9 = vshrl.u32 %v1753_v8, %v549_v3  ;;  %v564_v11 = vshrl.u32 %v1754_v10, %v549_v3  ;;  %v552_v13 = vshrl.u32 %v1755_v12, %v549_v3  ;;  %v389_v17 = vadd.s32 1, %v1558_v4 }
  0xc5   : > { %v555_v19 = vshrl.u32 %v1757_v18, %v549_v3  ;;  %v1878_v20 = vshll.u32 %v387_v5, 8  ;;  %v558_v24 = vshrl.u32 %v1756_v14, %v549_v3  ;;  %vm569_vm8 = vcmp.lt.s32.totalorder %v1876_v7, 4 }
  0xc6   : > { %v562_v25 = vor.u32 %v561_v9, %v560_v15  ;;  %vm390_vm7 = vcmp.gt.s32.totalorder %v389_v17, 0  ;;  %v565_v27 = vor.u32 %v564_v11, %v563_v16  ;;  %v553_v29 = vor.u32 %v552_v13, %v551_v22 }
  0xc7   : > { %v391_v28 = vsel %vm390_vm7, %v389_v17, 0  ;;  %v556_v30 = vor.u32 %v555_v19, %v554_v23  ;;  %v1885_v34 = vand.u32 65535, %v1878_v20  ;;  %v550_v35 = vshrl.u32 %v1758_v21, %v549_v3 }
  0xc8   : > { %v393_v31 = vand.u32 31, %v391_v28  ;;  %v559_v36 = vor.u32 %v558_v24, %v557_v26  ;;  %v575_v37 = vsel %vm569_vm8, %v562_v25, 920167782  ;;  %v1893_v39 = vshrl.u32 %v1878_v20, 16 }
  0xc9   : > { %vm566_vm9 = vcmp.lt.s32.totalorder %v1876_v7, 1  ;;  %v579_v40 = vsel %vm569_vm8, %v565_v27, 1326507024  ;;  %v1898_v41 = vshrl.u32 %v391_v28, 5  ;;  %vm568_vm10 = vcmp.lt.s32.totalorder %v1876_v7, 3 }
  0xca   : > { %v1890_v38 = vsub.s32 32, %v393_v31  ;;  %v574_v42 = vsel %vm566_vm9, %v553_v29, %v556_v30  ;;  %v405_v44 = vshll.u32 %v1756_v14, %v393_v31  ;;  %v408_v46 = vshll.u32 %v1753_v8, %v393_v31 }
  0xcb   : > { %v576_v51 = vsel %vm568_vm10, %v559_v36, %v575_v37  ;;  %v396_v53 = vshll.u32 %v1758_v21, %v393_v31  ;;  %v399_v54 = vshll.u32 %v1755_v12, %v393_v31  ;;  %vm567_vm11 = vcmp.lt.s32.totalorder %v1876_v7, 2 }
  0xcc   : > { %v397_v43 = vshrl.u32 %v1755_v12, %v1890_v38  ;;  %v406_v45 = vshrl.u32 %v1753_v8, %v1890_v38  ;;  %v400_v47 = vshrl.u32 %v1757_v18, %v1890_v38  ;;  %v403_v48 = vshrl.u32 %v1756_v14, %v1890_v38 }
  0xcd   : > { %v409_v49 = vshrl.u32 %v1754_v10, %v1890_v38  ;;  %v402_v56 = vshll.u32 %v1757_v18, %v393_v31  ;;  %v577_v60 = vsel %vm567_vm11, %v574_v42, %v576_v51  ;;  %v578_v61 = vsel %vm566_vm9, %v556_v30, %v559_v36 }
  0xce   : > { %v407_v55 = vor.u32 %v406_v45, %v405_v44  ;;  %v1916_v62 = vor.u32 %v397_v43, %v396_v53  ;;  %vm414_vm12 = vcmp.lt.s32.totalorder %v1898_v41, 4  ;;  %v571_v63 = vsel %vm569_vm8, %v559_v36, 2102212464 }
  0xcf   : > { %v410_v57 = vor.u32 %v409_v49, %v408_v46  ;;  %v580_v0 = vsel %vm568_vm10, %v562_v25, %v579_v40  ;;  %v1923_v2 = vor.u32 %v400_v47, %v399_v54  ;;  %v1925_v3 = vor.u32 %v403_v48, %v402_v56 }
  0xd0   : > { %v581_v4 = vsel %vm567_vm11, %v578_v61, %v580_v0  ;;  %v607_v5 = vand.u32 65535, %v577_v60  ;;  %v420_v8 = vsel %vm414_vm12, %v407_v55, 920167782  ;;  %v608_v11 = vshrl.u32 %v577_v60, 16 }
  0xd1   : > { %v585_v9 = vand.u32 65535, %v581_v4  ;;  %v586_v10 = vshrl.u32 %v581_v4, 16  ;;  %vm411_vm13 = vcmp.lt.s32.totalorder %v1898_v41, 1  ;;  %v424_v12 = vsel %vm414_vm12, %v410_v57, 1326507024 }
  0xd2   : > { %v570_v13 = vsel %vm566_vm9, %v550_v35, %v553_v29  ;;  %v611_v14 = vmul.u32 %v607_v5, %v584_v33  ;;  %vm413_vm14 = vcmp.lt.s32.totalorder %v1898_v41, 3  ;;  %v572_v15 = vsel %vm568_vm10, %v556_v30, %v571_v63 }
  0xd3   : > { %v588_v16 = vmul.u32 %v586_v10, %v583_v32  ;;  %v589_v17 = vmul.u32 %v585_v9, %v584_v33  ;;  %v419_v18 = vsel %vm411_vm13, %v1916_v62, %v1923_v2  ;;  %v421_v19 = vsel %vm413_vm14, %v1925_v3, %v420_v8 }
  0xd4   : > { %v423_v22 = vsel %vm411_vm13, %v1923_v2, %v1925_v3  ;;  %v610_v23 = vmul.u32 %v608_v11, %v583_v32  ;;  %v425_v24 = vsel %vm413_vm14, %v407_v55, %v424_v12  ;;  %v587_v25 = vmul.u32 %v585_v9, %v583_v32 }
  0xd5   : > { %v591_v26 = vshll.u32 %v588_v16, 16  ;;  %v609_v27 = vmul.u32 %v607_v5, %v583_v32  ;;  %v590_v28 = vmul.u32 %v586_v10, %v584_v33  ;;  %v612_v29 = vmul.u32 %v608_v11, %v584_v33 }
  0xd6   : > { %v613_v30 = vshll.u32 %v610_v23, 16  ;;  %v615_v31 = vshll.u32 %v611_v14, 16  ;;  %v593_v35 = vshll.u32 %v589_v17, 16  ;;  %vm412_vm0 = vcmp.lt.s32.totalorder %v1898_v41, 2 }
  0xd7   : > { %vm595_vm15 = vc.u32 %v587_v25, %v591_v26  ;;  %v597_v36 = vadd.s32 %v591_v26, %v587_v25  ;;  %v422_v42 = vsel %vm412_vm0, %v419_v18, %v421_v19  ;;  %v592_v43 = vshrl.u32 %v588_v16, 16 }
  0xd8   : > { %v596_v37 = vsel %vm595_vm15, 1, %v1752_v1  ;;  %vm617_vm1 = vc.u32 %v609_v27, %v613_v30  ;;  %v619_v40 = vadd.s32 %v613_v30, %v609_v27  ;;  %v614_v45 = vshrl.u32 %v610_v23, 16 }
  0xd9   : > { %v598_v44 = vadd.s32 %v596_v37, %v590_v28  ;;  %vm599_vm2 = vc.u32 %v597_v36, %v593_v35  ;;  %v618_v32 = vsel %vm617_vm1, 1, %v1752_v1  ;;  %v426_v49 = vsel %vm412_vm0, %v423_v22, %v425_v24 }
  0xda   : > { %v600_v33 = vsel %vm599_vm2, 1, %v1752_v1  ;;  %v620_v46 = vadd.s32 %v618_v32, %v612_v29  ;;  %vm621_vm3 = vc.u32 %v619_v40, %v615_v31  ;;  %v452_v51 = vand.u32 65535, %v422_v42 }
  0xdb   : > { %v602_v47 = vadd.s32 %v600_v33, %v598_v44  ;;  %v622_v48 = vsel %vm621_vm3, 1, %v1752_v1  ;;  %v430_v54 = vand.u32 65535, %v426_v49  ;;  %v431_v55 = vshrl.u32 %v426_v49, 16 }
  0xdc   : > { %v624_v53 = vadd.s32 %v622_v48, %v620_v46  ;;  %v453_v56 = vshrl.u32 %v422_v42, 16  ;;  %v573_v57 = vsel %vm567_vm11, %v570_v13, %v572_v15  ;;  %v594_v60 = vshrl.u32 %v589_v17, 16 }
  0xdd   : > { %v603_v61 = vadd.s32 %v602_v47, %v592_v43  ;;  %v616_v63 = vshrl.u32 %v611_v14, 16  ;;  %v433_v4 = vmul.u32 %v431_v55, %v1885_v34  ;;  %v434_v5 = vmul.u32 %v430_v54, %v1893_v39 }
  0xde   : > { %v625_v0 = vadd.s32 %v624_v53, %v614_v45  ;;  %v1967_v9 = vadd.s32 %v619_v40, %v615_v31  ;;  %v455_v10 = vmul.u32 %v453_v56, %v1885_v34  ;;  %v456_v11 = vmul.u32 %v452_v51, %v1893_v39 }
  0xdf   : > { %v1965_v8 = vadd.s32 %v603_v61, %v594_v60  ;;  %v627_v7 = vmul.u32 %v1874_v6, %v573_v57  ;;  %v432_v13 = vmul.u32 %v430_v54, %v1885_v34  ;;  %v436_v15 = vshll.u32 %v433_v4, 16 }
  0xe0   : > { %v626_v12 = vadd.s32 %v625_v0, %v616_v63  ;;  %v435_v14 = vmul.u32 %v431_v55, %v1893_v39  ;;  %v454_v16 = vmul.u32 %v452_v51, %v1885_v34  ;;  %v458_v17 = vshll.u32 %v455_v10, 16 }
  0xe1   : > { %vm629_vm4 = vc.u32 %v1965_v8, %v1967_v9  ;;  %v438_v19 = vshll.u32 %v434_v5, 16  ;;  %vm440_vm5 = vc.u32 %v432_v13, %v436_v15  ;;  %v442_v22 = vadd.s32 %v436_v15, %v432_v13 }
  0xe2   : > { %v630_v18 = vadd.s32 1, %v626_v12  ;;  %v441_v23 = vsel %vm440_vm5, 1, %v1752_v1  ;;  %v457_v24 = vmul.u32 %v453_v56, %v1893_v39  ;;  %v460_v6 = vshll.u32 %v456_v11, 16 }
  0xe3   : > { %vm462_vm6 = vc.u32 %v454_v16, %v458_v17  ;;  %v443_v26 = vadd.s32 %v441_v23, %v435_v14  ;;  %vm444_vm7 = vc.u32 %v442_v22, %v438_v19  ;;  %v464_v34 = vadd.s32 %v458_v17, %v454_v16 }
  0xe4   : > { %v631_v25 = vsel %vm629_vm4, %v630_v18, %v626_v12  ;;  %v463_v27 = vsel %vm462_vm6, 1, %v1752_v1  ;;  %v445_v29 = vsel %vm444_vm7, 1, %v1752_v1  ;;  %v437_v31 = vshrl.u32 %v433_v4, 16 }
  0xe5   : > { %v632_v28 = vadd.s32 %v631_v25, %v627_v7  ;;  %v465_v30 = vadd.s32 %v463_v27, %v457_v24  ;;  %v447_v35 = vadd.s32 %v445_v29, %v443_v26  ;;  %v416_v37 = vsel %vm414_vm12, %v1925_v3, 2102212464 }
  0xe6   : > { %vm466_vm8 = vc.u32 %v464_v34, %v460_v6  ;;  %v395_v39 = vshrl.u32 %v1758_v21, %v1890_v38  ;;  %v439_v44 = vshrl.u32 %v434_v5, 16  ;;  %v459_v32 = vshrl.u32 %v455_v10, 16 }
  0xe7   : > { %v633_v36 = vadd.s32 536870912, %v632_v28  ;;  %v448_v40 = vadd.s32 %v447_v35, %v437_v31  ;;  %v467_v42 = vsel %vm466_vm8, 1, %v1752_v1  ;;  %v417_v46 = vsel %vm413_vm14, %v1923_v2, %v416_v37 }
  0xe8   : > { %v469_v33 = vadd.s32 %v467_v42, %v465_v30  ;;  %v415_v45 = vsel %vm411_vm13, %v395_v39, %v1916_v62  ;;  %v461_v48 = vshrl.u32 %v456_v11, 16  ;;  %v468_v38 = vadd.s32 %v464_v34, %v460_v6 }
  0xe9   : > { %v634_v43 = vshrl.u32 %v633_v36, 30  ;;  %v449_v47 = vadd.s32 %v448_v40, %v439_v44  ;;  %v418_v1 = vsel %vm412_vm0, %v415_v45, %v417_v46  ;;  %v628_v41 = vadd.s32 %v1967_v9, %v1965_v8 }
  0xea   : > { %v470_v49 = vadd.s32 %v469_v33, %v459_v32  ;;  %v472_v62 = vmul.u32 %v1878_v20, %v418_v1  ;;  %vm2003_vm14 = vcmp.le.f32.partialorder %v534_v52, 0.7853982  ;;  %vm536_vm15 = vcmp.lt.s32.totalorder %v1862_v50, 0 }
  0xeb   : > { %v635_v3 = vshll.u32 %v634_v43, 30  ;;  %vm474_vm10 = vc.u32 %v449_v47, %v468_v38  ;;  %v658_v8 = vsub.s32 4, %v634_v43  ;;  %v473_v27 = vadd.s32 %v468_v38, %v449_v47 }
  0xec   : > { %v471_v51 = vadd.s32 %v470_v49, %v461_v48  ;;  %vm381_vm0 = vcmp.lt.s32.totalorder %v1868_v58, 0  ;;  %vm2016_vm1 = vcmp.le.f32.partialorder %v379_v59, 0.7853982  ;;  %vm677_vm2 = vweird.f32 %v1862_v50 }
  0xed   : > { %v636_v21 = vsub.s32 %v632_v28, %v635_v3  ;;  %v659_v34 = vsel %vm536_vm15, %v658_v8, %v634_v43 }
  0xee   : > { %v475_v54 = vadd.s32 1, %v471_v51  ;;  %v661_v44 = vsel %vm2003_vm14, 0, %v659_v34 }
  0xef   : > { %vm637_vm9 = vcmp.lt.s32.totalorder %v636_v21, 0  ;;  %v638_v53 = vsub.s32 0, %v636_v21  ;;  %v678_v48 = vadd.s32 3, %v661_v44 }
  0xf0   : > { %v476_v57 = vsel %vm474_vm10, %v475_v54, %v471_v51 }
  0xf1   : > { %v639_v55 = vsel %vm637_vm9, %v638_v53, %v636_v21  ;;  %v477_v2 = vadd.s32 %v476_v57, %v472_v62  ;;  %v679_v54 = vand.u32 3, %v678_v48  ;;  %v1650_v48 = vld [vmem:[%s298_s21] ss:$0 sm:$0xff] }
  0xf2   : > { %v640_v56 = vclz %v639_v55  ;;  %v987_v55 = vand.u32 3, %v661_v44 }
  0xf3   : > { %v478_v61 = vadd.s32 536870912, %v477_v2  ;;  %vm684_vm3 = vcmp.eq.s32.totalorder %v679_v54, 2  ;;  %vm680_vm6 = vcmp.lt.s32.totalorder %v679_v54, 2  ;;  %vm681_vm7 = vcmp.eq.s32.totalorder %v679_v54, 0 }
  0xf4   : > { %v1562_v60 = vadd.s32 4294967294, %v640_v56  ;;  %vm988_vm4 = vcmp.lt.s32.totalorder %v987_v55, 2  ;;  %vm989_vm5 = vcmp.eq.s32.totalorder %v987_v55, 0  ;;  %vm992_vm8 = vcmp.eq.s32.totalorder %v987_v55, 2 }
  0xf5   : > { %v1996_v0 = vshrl.u32 %v478_v61, 30 }
  0xf6   : > { %vm1563_vm11 = vcmp.lt.s32.totalorder %v1562_v60, 0 }
  0xf7   : > { %v643_v63 = vsel %vm1563_vm11, 0, %v1562_v60  ;;  %v480_v10 = vshll.u32 %v1996_v0, 30  ;;  %v503_v60 = vsub.s32 4, %v1996_v0 }
  0xf8   : > { %v644_v4 = vsub.s32 32, %v643_v63  ;;  %v648_v5 = vsub.s32 4294967266, %v643_v63  ;;  %v645_v11 = vshll.u32 %v636_v21, %v643_v63 }
  0xf9   : > { %v481_v20 = vsub.s32 %v477_v2, %v480_v10  ;;  %v504_v10 = vsel %vm381_vm0, %v503_v60, %v1996_v0 }
  0xfa   : > { %v646_v12 = vshrl.u32 %v628_v41, %v644_v4  ;;  %v649_v7 = vadd.s32 127, %v648_v5 }
  0xfb   : > { %vm482_vm12 = vcmp.lt.s32.totalorder %v481_v20, 0  ;;  %v483_v14 = vsub.s32 0, %v481_v20 }
  0xfc   : > { %v647_v13 = vor.u32 %v646_v12, %v645_v11  ;;  %v650_v15 = vshll.u32 %v649_v7, 23 }
  0xfd   : > { %v484_v17 = vsel %vm482_vm12, %v483_v14, %v481_v20 }
  0xfe   : > { %v651_v16 = vor.u32 4788187, %v650_v15  ;;  %v654_v19 = vcvt.s32.f32 %v647_v13  ;;  %v485_v22 = vclz %v484_v17  ;;  %v506_v17 = vsel %vm2016_vm1, 0, %v504_v10 }
  0xff   : > { %v523_v8 = vadd.s32 3, %v506_v17  ;;  %v833_v34 = vand.u32 3, %v506_v17 }
 0x100   : > { %v652_v18 = vand.u32 2147483647, %v651_v16  ;;  %v1559_v24 = vadd.s32 4294967294, %v485_v22 }
 0x101   : > { %vm834_vm11 = vcmp.lt.s32.totalorder %v833_v34, 2  ;;  %vm835_vm12 = vcmp.eq.s32.totalorder %v833_v34, 0 }
 0x102   : > { %v655_v23 = vmul.f32 %v654_v19, %v652_v18  ;;  %vm1560_vm13 = vcmp.lt.s32.totalorder %v1559_v24, 0 }
 0x103   : > { %v488_v25 = vsel %vm1560_vm13, 0, %v1559_v24  ;;  %vm838_vm13 = vcmp.eq.s32.totalorder %v833_v34, 2 }
 0x104   : > { %v656_v9 = vxor.u32 2147483648, %v655_v23  ;;  %v489_v28 = vsub.s32 32, %v488_v25  ;;  %v493_v29 = vsub.s32 4294967266, %v488_v25  ;;  %v490_v35 = vshll.u32 %v481_v20, %v488_v25 }
 0x106   : > { %v657_v26 = vsel %vm536_vm15, %v656_v9, %v655_v23  ;;  %v491_v36 = vshrl.u32 %v473_v27, %v489_v28  ;;  %v494_v37 = vadd.s32 127, %v493_v29  ;;  %v524_v27 = vand.u32 3, %v523_v8 }
 0x107   : > { %v660_v30 = vsel %vm2003_vm14, %v1862_v50, %v657_v26  ;;  %vm522_vm15 = vweird.f32 %v1868_v58 }
 0x108   : > { %v662_v31 = vmul.f32 %v660_v30, %v660_v30  ;;  %v492_v40 = vor.u32 %v491_v36, %v490_v35  ;;  %v495_v42 = vshll.u32 %v494_v37, 23  ;;  %vm529_vm9 = vcmp.eq.s32.totalorder %v524_v27, 2 }
 0x109   : > { %vm526_vm10 = vcmp.eq.s32.totalorder %v524_v27, 0  ;;  %vm525_vm14 = vcmp.lt.s32.totalorder %v524_v27, 2 }
 0x10a   : > { %v663_v52 = vmul.f32 -0.001358992, %v662_v31  ;;  %v670_v39 = vmul.f32 -0.00019511016, %v662_v31  ;;  %v496_v45 = vor.u32 4788187, %v495_v42  ;;  %v499_v47 = vcvt.s32.f32 %v492_v40 }
 0x10c   : > { %v664_v32 = vadd.f32 0.041655596, %v663_v52  ;;  %v671_v33 = vadd.f32 0.008332121, %v670_v39  ;;  %v497_v3 = vand.u32 2147483647, %v496_v45 }
 0x10e   : > { %v665_v46 = vmul.f32 %v664_v32, %v662_v31  ;;  %v672_v43 = vmul.f32 %v671_v33, %v662_v31  ;;  %v500_v38 = vmul.f32 %v499_v47, %v497_v3  ;;  %v1648_v3 = vld [vmem:[%s298_s21 + $0x2] ss:$0 sm:$0xff]  ;;  %v1649_v47 = vld [vmem:[%s298_s21 + $0x1] ss:$0 sm:$0xff] }
 0x110   : > { %v666_v49 = vadd.f32 -0.4999988, %v665_v46  ;;  %v673_v21 = vadd.f32 -0.16666654, %v672_v43  ;;  %v501_v53 = vxor.u32 2147483648, %v500_v38 }
 0x112   : > { %v667_v51 = vmul.f32 %v666_v49, %v662_v31  ;;  %v674_v1 = vmul.f32 %v673_v21, %v662_v31  ;;  %v502_v2 = vsel %vm381_vm0, %v501_v53, %v500_v38  ;;  %vm1005_vm0 = vcmask 64512   ;;  %v1651_v53 = vld [vmem:[%s298_s21 + $0x3] ss:$0 sm:$0xff]  ;;  %s1446_s21 = sshll.u32 %s1443_s20, 4  ;;  %s1447_s21 = int_to_ptr.hbm [resolvable:$true] %s1446_s21 }
 0x113   : > { %v505_v61 = vsel %vm2016_vm1, %v1868_v58, %v502_v2  ;;  %vm1008_vm1 = vcmask 130048   ;;  %v1040_v58 = vlaneseq  ;;  %v1760_v49 = vmov 0.0   ;;  %s1702_s27 = sshra.s32 %s1447_s21, 4  ;;  %s1703_s27 = int_to_ptr.hbm [resolvable:$true] %s1702_s27 }
 0x114   : > { %v668_v56 = vadd.f32 1.0, %v667_v51  ;;  %v675_v57 = vadd.f32 1.0, %v674_v1  ;;  %v507_v4 = vmul.f32 %v505_v61, %v505_v61  ;;  %s1704_s29 = scalar_lea.hbm %s1703_s27, 64  ;;  %p1709_p0 = scmp.lt.s32.totalorder %s1703_s27, %s2216_s6 }
 0x115   : > { %v1041_v46 = vshrl.u32 %v1040_v58, 7  ;;  %v1044_v43 = vand.u32 127, %v1040_v58  ;;  %p1705_p11 = scmp.ne.s32.totalorder %s1703_s27, %s1704_s29  ;;  %p1710_p1 = scmp.lt.s32.totalorder %s1708_s11, %s1704_s29 }
 0x116   : > { %v676_v63 = vmul.f32 %v675_v57, %v660_v30  ;;  %v685_v41 = vxor.u32 2147483648, %v668_v56  ;;  %v508_v11 = vmul.f32 -0.001358992, %v507_v4  ;;  %v515_v12 = vmul.f32 -0.00019511016, %v507_v4 }
 0x117   : > { %v1042_v62 = vadd.s32 8, %v1041_v46  ;;  %p1706_p12 = pnand %p1705_p11, %p1838_p5  ;;  %p1711_p2 = por %p1710_p1, %p1709_p0 }
 0x118   : > { %v682_v59 = vxor.u32 2147483648, %v676_v63  ;;  %v686_v5 = vsel %vm684_vm3, %v685_v41, %v676_v63  ;;  %v994_v20 = vsel %vm992_vm8, %v685_v41, %v676_v63  ;;  %v509_v15 = vadd.f32 0.041655596, %v508_v11 }
 0x119   : > { %v516_v18 = vadd.f32 0.008332121, %v515_v12  ;;  %p1707_p13 = pneg %p1706_p12 }
 0x11a   : > { %v991_v7 = vsel %vm989_vm5, %v668_v56, %v682_v59  ;;  %v683_v13 = vsel %vm681_vm7, %v668_v56, %v682_v59  ;;  %v510_v22 = vmul.f32 %v509_v15, %v507_v4 }
 0x11b   : > { %v995_v14 = vsel %vm988_vm4, %v991_v7, %v994_v20  ;;  %v687_v16 = vsel %vm680_vm6, %v683_v13, %v686_v5  ;;  %v517_v23 = vmul.f32 %v516_v18, %v507_v4  ;;  %vm1046_vm6 = vcmp.eq.s32.totalorder %v1042_v62, %v1044_v43  ;;  %p1712_p3 = pnand %p1711_p2, %p1707_p13 }
 0x11c   : > { %v996_v19 = vsel %vm677_vm2, nan, %v995_v14  ;;  %v688_v0 = vsel %vm677_vm2, nan, %v687_v16  ;;  %v511_v24 = vadd.f32 -0.4999988, %v510_v22  ;;  %vm1045_vm2 = vcmp.eq.s32.totalorder %v1041_v46, %v1044_v43 }
 0x11d   : > { %1001 = vrot.lane.b32.xlu1 %v996_v19, %s1759_s17  ;;  %v518_v9 = vadd.f32 -0.16666654, %v517_v23  ;;  %v1574_v21 = vsel %vm1045_vm2, 1.0, %v1760_v49 }
 0x11e   : > { %v512_v6 = vmul.f32 %v511_v24, %v507_v4  ;;  %v1071_v38 = vadd.f32 %v1648_v3, %v1574_v21  ;;  %v1069_v51 = vadd.f32 %v1649_v47, %v1574_v21  ;;  %v1067_v1 = vadd.f32 %v1650_v48, %v1574_v21 }
 0x11f   : > { %v519_v25 = vmul.f32 %v518_v9, %v507_v4  ;;  %v1073_v60 = vadd.f32 %v1651_v53, %v1574_v21  ;;  %v1575_v4 = vsel %vm1046_vm6, 1.0, %v1760_v49 }
 0x120   : > { %v513_v26 = vadd.f32 1.0, %v512_v6  ;;  %vm1079_vm3 = vcmp.lt.f32.partialorder %v1071_v38, 0.5  ;;  %vm1077_vm4 = vcmp.lt.f32.partialorder %v1069_v51, 0.5  ;;  %vm1075_vm5 = vcmp.lt.f32.partialorder %v1067_v1, 0.5 }
 0x121   : > { %v520_v28 = vadd.f32 1.0, %v519_v25  ;;  %vm1081_vm7 = vcmp.lt.f32.partialorder %v1073_v60, 0.5  ;;  %v1068_v10 = vadd.f32 %v1650_v48, %v1575_v4  ;;  %v1070_v20 = vadd.f32 %v1649_v47, %v1575_v4  ;;  %v1308_v60 = vld [vmem:[%s303_s30 + $0x28] sm:$0xff] }
 0x122   : > { %v530_v29 = vxor.u32 2147483648, %v513_v26  ;;  %v1072_v14 = vadd.f32 %v1648_v3, %v1575_v4  ;;  %v1074_v18 = vadd.f32 %v1651_v53, %v1575_v4 }
 0x123   : > { %v521_v30 = vmul.f32 %v520_v28, %v505_v61  ;;  %vm1076_vm8 = vcmp.lt.f32.partialorder %v1068_v10, 0.5  ;;  %v2100_v10 = vld [vmem:[%s2094_s12 + $0x20] sm:$0xff] }
 0x125   : > { %v527_v31 = vxor.u32 2147483648, %v521_v30  ;;  %v531_v50 = vsel %vm529_vm9, %v530_v29, %v521_v30  ;;  %v840_v36 = vsel %vm838_vm13, %v530_v29, %v521_v30  ;;  %vm1078_vm9 = vcmp.lt.f32.partialorder %v1070_v20, 0.5 }
 0x127   : > { %v837_v35 = vsel %vm835_vm12, %v513_v26, %v527_v31  ;;  %v528_v37 = vsel %vm526_vm10, %v513_v26, %v527_v31  ;;  %vm1080_vm10 = vcmp.lt.f32.partialorder %v1072_v14, 0.5  ;;  %v2114_v14 = vld [vmem:[%s2094_s12 + $0x18] sm:$0xff] }
 0x128   : > { %v841_v52 = vsel %vm834_vm11, %v837_v35, %v840_v36  ;;  %v532_v39 = vsel %vm525_vm14, %v528_v37, %v531_v50  ;;  %vm1082_vm11 = vcmp.lt.f32.partialorder %v1074_v18, 0.5 }
 0x129   : > { %v842_v40 = vsel %vm522_vm15, nan, %v841_v52  ;;  %v533_v42 = vsel %vm522_vm15, nan, %v532_v39 }
 0x12a   : > { %999 = vrot.lane.b32.xlu1 %v842_v40, %s1759_s17 }
 0x18f   : > { %v1002_v44 = vpop.permute.xlu1 %1001 }
 0x190   : > { %v1007_v32 = vsel %vm1005_vm0, %v688_v0, %v1002_v44 }
 0x191   : > { %1570 = vmatpush.xpose.msk.msra.mxu0 %vm1008_vm1, %v1007_v32 }
 0x19c   : > { %v1000_v33 = vpop.permute.xlu1 %999 }
 0x19d   : > { %v1006_v45 = vsel %vm1005_vm0, %v533_v42, %v1000_v33 }
 0x19e   : > { %1571 = vmatpush.xpose.msk.msra.mxu0 %vm1008_vm1, %v1006_v45 }
 0x1a1   : > { %1572 = vmatmul.msk.f32.vlgmr.msra.gmra.mxu0 %vm1008_vm1, %v1006_v45 }
 0x1a9   : > { %1573 = vmatmul.msk.f32.gmra.mxu0 %vm1008_vm1, %v1007_v32 }
 0x21e   : > { %v1032_v54 = vpop.f32.mrf.mxu0 }
 0x21f   : > { %v1038_v55 = vmul.f32 0.25, %v1032_v54 }
 0x221   : > { %v1087_v56 = vsel %vm1079_vm3, -1e+09, %v1038_v55  ;;  %v1085_v57 = vsel %vm1077_vm4, -1e+09, %v1038_v55  ;;  %v1083_v2 = vsel %vm1075_vm5, -1e+09, %v1038_v55 }
 0x222   : > { %v1103_v61 = vsel %vm1008_vm1, %v1087_v56, -inf  ;;  %v1097_v63 = vsel %vm1008_vm1, %v1085_v57, -inf  ;;  %v1091_v41 = vsel %vm1008_vm1, %v1083_v2, -inf  ;;  %v1089_v59 = vsel %vm1081_vm7, -1e+09, %v1038_v55 }
 0x223   : > { %1104 = vmax.xlane.f32.xlu1 %v1103_v61  ;;  %1098 = vmax.xlane.f32.xlu0 %v1097_v63  ;;  %v1109_v11 = vsel %vm1008_vm1, %v1089_v59, -inf }
 0x224   : > { %1092 = vmax.xlane.f32.xlu2 %v1091_v41  ;;  %v1309_v41 = vld [vmem:[%s303_s30 + $0x30] sm:$0xff] }
 0x225   : > { %v1365_v4 = vsub.f32 1.0, %v1309_v41 }
 0x226   : > { %v1035_v5 = vpop.f32.mrf.mxu0 }
 0x227   : > { %v1039_v12 = vmul.f32 0.25, %v1035_v5  ;;  %v2097_v5 = vld [vmem:[%s2094_s12 + $0x28] sm:$0xff] }
 0x228   : > { %1265 = vmatpush.msra.mxu3 %v2097_v5 }
 0x229   : > { %v1084_v7 = vsel %vm1076_vm8, -1e+09, %v1039_v12  ;;  %v1086_v15 = vsel %vm1078_vm9, -1e+09, %v1039_v12  ;;  %v1088_v17 = vsel %vm1080_vm10, -1e+09, %v1039_v12 }
 0x22a   : > { %v1094_v13 = vsel %vm1008_vm1, %v1084_v7, -inf  ;;  %v1100_v16 = vsel %vm1008_vm1, %v1086_v15, -inf  ;;  %v1106_v19 = vsel %vm1008_vm1, %v1088_v17, -inf  ;;  %v1090_v0 = vsel %vm1082_vm11, -1e+09, %v1039_v12  ;;  %1266 = vmatpush.msra.mxu3 %v2100_v10  ;;  %v1305_v12 = vld [vmem:[%s303_s30 + $0x10] sm:$0xff] }
 0x22b   : > { %v1112_v22 = vsel %vm1008_vm1, %v1090_v0, -inf  ;;  %v1361_v20 = vsub.f32 1.0, %v1305_v12 }
 0x22c   : > { %1110 = vmax.xlane.f32.xlu2 %v1109_v11  ;;  %v1310_v11 = vld [vmem:[%s303_s30 + $0x38] sm:$0xff] }
 0x234   : > { %1095 = vmax.xlane.f32.xlu2 %v1094_v13  ;;  %v1364_v13 = vsub.f32 1.0, %v1308_v60 }
 0x23c   : > { %1101 = vmax.xlane.f32.xlu2 %v1100_v16  ;;  %v2117_v16 = vld [vmem:[%s2094_s12 + $0x10] sm:$0xff] }
 0x244   : > { %1107 = vmax.xlane.f32.xlu2 %v1106_v19  ;;  %v2123_v19 = vld [vmem:[%s2094_s12 + $0x38] sm:$0xff] }
 0x24c   : > { %1113 = vmax.xlane.f32.xlu2 %v1112_v22 }
 0x296   : > { %v1105_v23 = vpop.xlane.xlu1 %1104  ;;  %v1099_v24 = vpop.xlane.xlu0 %1098 }
 0x297   : > { %v1119_v8 = vsub.f32 %v1087_v56, %v1105_v23  ;;  %v1117_v9 = vsub.f32 %v1085_v57, %v1099_v24  ;;  %v1093_v6 = vpop.xlane.xlu2 %1092  ;;  %v1303_v56 = vld [vmem:[%s303_s30] sm:$0xff]  ;;  %v1306_v57 = vld [vmem:[%s303_s30 + $0x18] sm:$0xff] }
 0x298   : > { %v1115_v35 = vsub.f32 %v1083_v2, %v1093_v6  ;;  %v1304_v2 = vld [vmem:[%s303_s30 + $0x8] sm:$0xff]  ;;  %v1359_v61 = vsub.f32 1.0, %v1303_v56  ;;  %v1362_v63 = vsub.f32 1.0, %v1306_v57 }
 0x299   : > { %v1131_v25 = vmul.f32 1.442695, %v1119_v8  ;;  %v1127_v26 = vmul.f32 1.442695, %v1117_v9  ;;  %v1366_v8 = vsub.f32 1.0, %v1310_v11 }
 0x29a   : > { %v1123_v37 = vmul.f32 1.442695, %v1115_v35 }
 0x29b   : > { %1656 = vpow2.f32 %v1131_v25 }
 0x29c   : > { %1658 = vpow2.f32 %v1127_v26 }
 0x29f   : > { %v1111_v27 = vpop.xlane.xlu2 %1110 }
 0x2a0   : > { %v1121_v42 = vsub.f32 %v1089_v59, %v1111_v27  ;;  %v1307_v59 = vld [vmem:[%s303_s30 + $0x20] sm:$0xff] }
 0x2a1   : > { %v2055_v28 = vpop.eup %1656  ;;  %v1363_v23 = vsub.f32 1.0, %v1307_v59 }
 0x2a2   : > { %v2057_v29 = vpop.eup %1658  ;;  %v1151_v34 = vsel %vm1008_vm1, %v2055_v28, 0.0  ;;  %v1135_v33 = vmul.f32 1.442695, %v1121_v42 }
 0x2a3   : > { %1152 = vadd.xlane.f32.xlu1 %v1151_v34  ;;  %v1145_v30 = vsel %vm1008_vm1, %v2057_v29, 0.0 }
 0x2a4   : > { %1146 = vadd.xlane.f32.xlu0 %v1145_v30 }
 0x2a7   : > { %v1096_v31 = vpop.xlane.xlu2 %1095 }
 0x2a8   : > { %v1116_v50 = vsub.f32 %v1084_v7, %v1096_v31  ;;  %v2105_v7 = vld [vmem:[%s2094_s12 + $0x8] sm:$0xff] }
 0x2a9   : > { %1593 = vmatpush.msra.mxu2 %v2105_v7  ;;  %1207 = vmatpush.msra.mxu1 %v2105_v7 }
 0x2aa   : > { %v1125_v36 = vmul.f32 1.442695, %v1116_v50 }
 0x2ac   : > { %1660 = vpow2.f32 %v1125_v36 }
 0x2ad   : > { %1662 = vpow2.f32 %v1123_v37 }
 0x2af   : > { %v1102_v52 = vpop.xlane.xlu2 %1101 }
 0x2b0   : > { %v1118_v39 = vsub.f32 %v1086_v15, %v1102_v52  ;;  %v2110_v15 = vld [vmem:[%s2094_s12] sm:$0xff] }
 0x2b1   : > { %1594 = vmatpush.msra.mxu2 %v2110_v15  ;;  %1208 = vmatpush.msra.mxu1 %v2110_v15 }
 0x2b2   : > { %v2063_v40 = vpop.eup %1660  ;;  %v1129_v44 = vmul.f32 1.442695, %v1118_v39 }
 0x2b3   : > { %v1142_v32 = vsel %vm1008_vm1, %v2063_v40, 0.0  ;;  %v2067_v58 = vpop.eup %1662  ;;  %1236 = vmatpush.msrb.mxu2 %v2114_v14  ;;  %1294 = vmatpush.msrb.mxu1 %v2123_v19 }
 0x2b4   : > { %1664 = vpow2.f32 %v1129_v44  ;;  %1143 = vadd.xlane.f32.xlu2 %v1142_v32  ;;  %v1139_v47 = vsel %vm1008_vm1, %v2067_v58, 0.0 }
 0x2b5   : > { %1666 = vpow2.f32 %v1135_v33  ;;  %1237 = vmatpush.msrb.mxu2 %v2117_v16 }
 0x2b7   : > { %v1108_v45 = vpop.xlane.xlu2 %1107 }
 0x2b8   : > { %v1120_v46 = vsub.f32 %v1088_v17, %v1108_v45  ;;  %v1360_v17 = vsub.f32 1.0, %v1304_v2 }
 0x2ba   : > { %v2069_v43 = vpop.eup %1664  ;;  %v1133_v3 = vmul.f32 1.442695, %v1120_v46 }
 0x2bb   : > { %v1148_v48 = vsel %vm1008_vm1, %v2069_v43, 0.0  ;;  %v2075_v21 = vpop.eup %1666 }
 0x2bc   : > { %1668 = vpow2.f32 %v1133_v3  ;;  %1140 = vadd.xlane.f32.xlu2 %v1139_v47  ;;  %1149 = vadd.xlane.f32.xlu0 %v1148_v48  ;;  %v1157_v53 = vsel %vm1008_vm1, %v2075_v21, 0.0 }
 0x2bf   : > { %v1114_v49 = vpop.xlane.xlu2 %1113 }
 0x2c0   : > { %v1122_v38 = vsub.f32 %v1090_v0, %v1114_v49  ;;  %v2126_v0 = vld [vmem:[%s2094_s12 + $0x30] sm:$0xff] }
 0x2c1   : > { %1295 = vmatpush.msrb.mxu1 %v2126_v0 }
 0x2c2   : > { %v2077_v51 = vpop.eup %1668  ;;  %v1137_v1 = vmul.f32 1.442695, %v1122_v38 }
 0x2c3   : > { %v1154_v54 = vsel %vm1008_vm1, %v2077_v51, 0.0 }
 0x2c4   : > { %1670 = vpow2.f32 %v1137_v1  ;;  %1158 = vadd.xlane.f32.xlu2 %v1157_v53  ;;  %1155 = vadd.xlane.f32.xlu1 %v1154_v54 }
 0x2ca   : > { %v2084_v55 = vpop.eup %1670 }
 0x2cb   : > { %v1160_v62 = vsel %vm1008_vm1, %v2084_v55, 0.0 }
 0x2cc   : > { %1161 = vadd.xlane.f32.xlu2 %v1160_v62 }
 0x2d0   : > { %1313 = vperm.xlu0 %1644, %v1303_v56  }
 0x2d8   : > { %1328 = vperm.xlu0 %1644, %v1306_v57  }
 0x2dd   : > { %1318 = vperm.xlu1 %1645, %v1304_v2  }
 0x2e0   : > { %1338 = vperm.xlu0 %1644, %v1308_v60  }
 0x2e4   : > { %1323 = vperm.xlu2 %1646, %v1305_v12  }
 0x2e5   : > { %1333 = vperm.xlu1 %1645, %v1307_v59  }
 0x2e8   : > { %1369 = vperm.xlu0 %1644, %v1359_v61  }
 0x2ec   : > { %1343 = vperm.xlu2 %1646, %v1309_v41  }
 0x2ed   : > { %1348 = vperm.xlu1 %1645, %v1310_v11  }
 0x2f0   : > { %1384 = vperm.xlu0 %1644, %v1362_v63  }
 0x2f4   : > { %1374 = vperm.xlu2 %1646, %v1360_v17  }
 0x2f5   : > { %1379 = vperm.xlu1 %1645, %v1361_v20  }
 0x2f8   : > { %1399 = vperm.xlu0 %1644, %v1365_v4  }
 0x2fc   : > { %1389 = vperm.xlu2 %1646, %v1363_v23  }
 0x2fd   : > { %1394 = vperm.xlu1 %1645, %v1364_v13  }
 0x304   : > { %1404 = vperm.xlu2 %1646, %v1366_v8  }
 0x316   : > { %v1153_v18 = vpop.xlane.xlu1 %1152 }
 0x317   : > { %1672 = vrcp.f32 %v1153_v18  ;;  %v1147_v6 = vpop.xlane.xlu0 %1146 }
 0x31d   : > { %v1673_v22 = vpop.eup %1672 }
 0x31e   : > { %v1175_v24 = vmul.f32 %v1673_v22, %v2055_v28 }
 0x320   : > { %1580 = vmatmul.msk.f32.vlgmr.msra.gmra.mxu3 %vm1008_vm1, %v1175_v24 }
 0x327   : > { %v1144_v9 = vpop.xlane.xlu2 %1143 }
 0x328   : > { %1674 = vrcp.f32 %v1144_v9 }
 0x329   : > { %1676 = vrcp.f32 %v1147_v6 }
 0x32e   : > { %v1675_v25 = vpop.eup %1674 }
 0x32f   : > { %v1141_v26 = vpop.xlane.xlu2 %1140  ;;  %v1172_v27 = vmul.f32 %v1675_v25, %v2063_v40  ;;  %v1150_v34 = vpop.xlane.xlu0 %1149 }
 0x330   : > { %1678 = vrcp.f32 %v1141_v26  ;;  %v1677_v30 = vpop.eup %1676 }
 0x331   : > { %1577 = vmatmul.msk.f32.vlgmr.msra.gmra.mxu2 %vm1008_vm1, %v1172_v27  ;;  %1680 = vrcp.f32 %v1150_v34  ;;  %v1173_v35 = vmul.f32 %v1677_v30, %v2057_v29 }
 0x336   : > { %v1679_v28 = vpop.eup %1678 }
 0x337   : > { %v1156_v31 = vpop.xlane.xlu1 %1155  ;;  %v1159_v50 = vpop.xlane.xlu2 %1158  ;;  %v1171_v36 = vmul.f32 %v1679_v28, %v2067_v58 }
 0x338   : > { %1682 = vrcp.f32 %v1156_v31  ;;  %v1681_v37 = vpop.eup %1680 }
 0x339   : > { %1684 = vrcp.f32 %v1159_v50  ;;  %1578 = vmatmul.msk.f32.vlgmr.msrb.gmra.mxu2 %vm1008_vm1, %v1173_v35  ;;  %1576 = vmatmul.msk.f32.vlgmr.msra.gmra.mxu1 %vm1008_vm1, %v1171_v36  ;;  %v1174_v42 = vmul.f32 %v1681_v37, %v2069_v43 }
 0x33e   : > { %v1683_v52 = vpop.eup %1682 }
 0x33f   : > { %v1685_v39 = vpop.eup %1684  ;;  %v1162_v40 = vpop.xlane.xlu2 %1161  ;;  %v1176_v44 = vmul.f32 %v1683_v52, %v2077_v51 }
 0x340   : > { %1686 = vrcp.f32 %v1162_v40  ;;  %v1177_v29 = vmul.f32 %v1685_v39, %v2075_v21 }
 0x341   : > { %1579 = vmatmul.msk.f32.gmra.mxu2 %vm1008_vm1, %v1174_v42  ;;  %1581 = vmatmul.msk.f32.gmra.mxu3 %vm1008_vm1, %v1176_v44 }
 0x342   : > { %1582 = vmatmul.msk.f32.vlgmr.msrb.gmra.mxu1 %vm1008_vm1, %v1177_v29  ;;  %v1314_v58 = vpop.permute.xlu0 %1313 }
 0x343   : > { %v1351_v63 = vmul.f32 %v1314_v58, %v2110_v15 }
 0x346   : > { %v1687_v32 = vpop.eup %1686 }
 0x347   : > { %v1178_v33 = vmul.f32 %v1687_v32, %v2084_v55  ;;  %v1324_v45 = vpop.permute.xlu2 %1323 }
 0x348   : > { %v1353_v11 = vmul.f32 %v1324_v45, %v2117_v16 }
 0x34a   : > { %1583 = vmatmul.msk.f32.gmra.mxu1 %vm1008_vm1, %v1178_v33  ;;  %v1329_v43 = vpop.permute.xlu0 %1328 }
 0x34b   : > { %v1354_v16 = vmul.f32 %v1329_v43, %v2114_v14 }
 0x34f   : > { %v1344_v46 = vpop.permute.xlu2 %1343  ;;  %v1319_v3 = vpop.permute.xlu1 %1318 }
 0x350   : > { %v1352_v57 = vmul.f32 %v1319_v3, %v2105_v7  ;;  %v1357_v17 = vmul.f32 %v1344_v46, %v2126_v0 }
 0x352   : > { %v1339_v48 = vpop.permute.xlu0 %1338 }
 0x353   : > { %v1356_v0 = vmul.f32 %v1339_v48, %v2097_v5 }
 0x357   : > { %v1375_v47 = vpop.permute.xlu2 %1374  ;;  %v1334_v49 = vpop.permute.xlu1 %1333 }
 0x358   : > { %v1355_v21 = vmul.f32 %v1334_v49, %v2100_v10 }
 0x35a   : > { %v1370_v54 = vpop.permute.xlu0 %1369 }
 0x35f   : > { %v1390_v38 = vpop.permute.xlu2 %1389  ;;  %v1349_v55 = vpop.permute.xlu1 %1348 }
 0x360   : > { %v1358_v34 = vmul.f32 %v1349_v55, %v2123_v19 }
 0x362   : > { %v1385_v56 = vpop.permute.xlu0 %1384 }
 0x367   : > { %v1380_v4 = vpop.permute.xlu1 %1379  ;;  %v1405_v6 = vpop.permute.xlu2 %1404 }
 0x36a   : > { %v1400_v7 = vpop.permute.xlu0 %1399 }
 0x36f   : > { %v1395_v22 = vpop.permute.xlu1 %1394 }
 0x3a3   : > { %v1268_v51 = vpop.f32.mrf.mxu3 }
 0x3a4   : > { %v1411_v1 = vmul.f32 %v1390_v38, %v1268_v51 }
 0x3a6   : > { %v1419_v53 = vadd.f32 %v1411_v1, %v1355_v21 }
 0x3a8   : > { %1427 = vst.msk [vmem:[%s2150_s15 + $0x20] sm:$0xff] %vm1008_vm1, %v1419_v53 }
 0x3b4   : > { %v1213_v62 = vpop.f32.mrf.mxu2 }
 0x3b5   : > { %v1408_v2 = vmul.f32 %v1375_v47, %v1213_v62 }
 0x3b6   : > { %v1210_v61 = vpop.f32.mrf.mxu1 }
 0x3b7   : > { %v1416_v60 = vadd.f32 %v1408_v2, %v1352_v57  ;;  %v1407_v41 = vmul.f32 %v1370_v54, %v1210_v61 }
 0x3b9   : > { %1424 = vst.msk [vmem:[%s2150_s15 + $0x8] sm:$0xff] %vm1008_vm1, %v1416_v60  ;;  %v1415_v59 = vadd.f32 %v1407_v41, %v1351_v63 }
 0x3bb   : > { %1423 = vst.msk [vmem:[%s2150_s15] sm:$0xff] %vm1008_vm1, %v1415_v59 }
 0x3bc   : > { %v1239_v10 = vpop.f32.mrf.mxu2 }
 0x3bd   : > { %v1409_v12 = vmul.f32 %v1380_v4, %v1239_v10 }
 0x3bf   : > { %v1417_v20 = vadd.f32 %v1409_v12, %v1353_v11  ;;  %v1297_v13 = vpop.f32.mrf.mxu1 }
 0x3c0   : > { %v1413_v18 = vmul.f32 %v1400_v7, %v1297_v13 }
 0x3c1   : > { %1425 = vst.msk [vmem:[%s2150_s15 + $0x10] sm:$0xff] %vm1008_vm1, %v1417_v20 }
 0x3c2   : > { %v1421_v15 = vadd.f32 %v1413_v18, %v1357_v17 }
 0x3c4   : > { %1429 = vst.msk [vmem:[%s2150_s15 + $0x30] sm:$0xff] %vm1008_vm1, %v1421_v15  ;;  %v1242_v23 = vpop.f32.mrf.mxu2  ;;  %v1271_v24 = vpop.f32.mrf.mxu3 }
 0x3c5   : > { %v1410_v8 = vmul.f32 %v1385_v56, %v1242_v23  ;;  %v1412_v9 = vmul.f32 %v1395_v22, %v1271_v24 }
 0x3c7   : > { %v1418_v25 = vadd.f32 %v1410_v8, %v1354_v16  ;;  %v1420_v26 = vadd.f32 %v1412_v9, %v1356_v0  ;;  %v1300_v27 = vpop.f32.mrf.mxu1 }
 0x3c8   : > { %v1414_v30 = vmul.f32 %v1405_v6, %v1300_v27 }
 0x3c9   : > { %1426 = vst.msk [vmem:[%s2150_s15 + $0x18] sm:$0xff] %vm1008_vm1, %v1418_v25 }
 0x3ca   : > { %1428 = vst.msk [vmem:[%s2150_s15 + $0x28] sm:$0xff] %vm1008_vm1, %v1420_v26  ;;  %v1422_v5 = vadd.f32 %v1414_v30, %v1358_v34 }
 0x3cc   : > { %1430 = vst.msk [vmem:[%s2150_s15 + $0x38] sm:$0xff] %vm1008_vm1, %v1422_v5 }
 0x3cd   : > { %1715 = shalt.err (!%p1712_p3)
}
 0x3ce   : > { %s1761_s13 = smov 128  }
 0x3cf   : > { %1595 = dma.vmem_to_hbm [thread:$0]  (%p1838_p5), %s1445_s4, 1024, %s1447_s21, %s1432_s22, %s1761_s13, %s1761_s13, %s1759_s17  }
 0x3d0 PF: > { %p1601_p4 = scmp.ge.s32.totalorder %s1750_s26, 2  ;;  %s1461_s15 = sand.u32 1, %s1738_s23  }
 0x3d1   : > { %s1462_s16 = scalar_lea.sflag [#allocation4], %s1461_s15 }
 0x3d2   : > { %p1598_p7 = pnand %p1601_p4, %p1842_p6 }
 0x3d4   : > { %p1599_p8 = pneg %p1598_p7 }
 0x3d6   : > { %1733 = dma.done.wait (%p1599_p8), %s1462_s16, 1024  }
 0x3d7   : > { %1735 = vsyncadd (%p1599_p8), %s1462_s16, 4294966272  ;;  %p18_p9 = scmp.ge.s32.totalorder %s1825_s28, 4   ;;  %s2223_s23 = smov %s1742_s24 }
 0x3d8   : > { %s2224_s24 = smov %s1746_s25  ;;  %s2225_s25 = smov %s1836_s7 }
 0x3d9   : > { %s2226_s26 = smov %s1825_s28  ;;  %20 = sbr.rel (!%p18_p9) target bundleno = 6 (0x6), region = 88 }
 0x3de   :  { %1468 = vsyncpa [#allocation4], 1 }
 0x3df   :  { %1470 = vsyncpa [#allocation4 + $0x1], 1 }

</bundles_post_ra>
